<compile_context>
chip_gen: v7x
topology: tpu7x:2x2x1
jax: 0.10.0
libtpu: 0.0.40
codegen_flags: <defaults>
</compile_context>

<pallas_src>
import functools
import math

import numpy as np

import jax
import jax.numpy as jnp
from jax.experimental import pallas as pl
from jax.experimental.pallas import tpu as pltpu

# ----------------------- module "__init__" constants -----------------------
SAMPLE_RATE = 16000
N_FFT = 256                     # small but structurally identical to default (400)
WIN_LENGTH = N_FFT              # default: win_length = n_fft
HOP_LENGTH = WIN_LENGTH // 2    # default: hop = win // 2
N_FREQ = N_FFT // 2 + 1         # onesided = 129
N_MELS = 128                    # default n_mels
N_MFCC = 40                     # default n_mfcc
TOP_DB = 80.0                   # AmplitudeToDB('power', 80.0)
AMIN = 1e-10
DB_MULTIPLIER = 0.0             # log10(max(amin, ref=1.0)) == 0

N_FREQ_PAD = ((N_FREQ + 127) // 128) * 128      # 256 lanes per DFT half
N_MFCC_PAD = ((N_MFCC + 127) // 128) * 128      # 128 lanes, lane-dense output
TILE_F_MAX = 512                # frame-tile rows; ~3 MiB/step f32 -> fits v5e/v6e/v7x VMEM


# ----------------------- deterministic parameter setup (numpy, baked as constants) ----
def _hann_window_np(win_length):
    # torch.hann_window default is periodic=True
    n = np.arange(win_length, dtype=np.float64)
    return 0.5 - 0.5 * np.cos(2.0 * np.pi * n / win_length)


def _mel_fbanks_np(n_freq, f_min, f_max, n_mels, sample_rate):
    # torchaudio.functional.melscale_fbanks, mel_scale='htk', norm=None
    all_freqs = np.linspace(0.0, sample_rate / 2.0, n_freq)
    m_min = 2595.0 * np.log10(1.0 + f_min / 700.0)
    m_max = 2595.0 * np.log10(1.0 + f_max / 700.0)
    m_pts = np.linspace(m_min, m_max, n_mels + 2)
    f_pts = 700.0 * (10.0 ** (m_pts / 2595.0) - 1.0)
    f_diff = f_pts[1:] - f_pts[:-1]                      # (n_mels+1,)
    slopes = f_pts[None, :] - all_freqs[:, None]         # (n_freq, n_mels+2)
    down = -slopes[:, :-2] / f_diff[:-1]
    up = slopes[:, 2:] / f_diff[1:]
    fb = np.maximum(0.0, np.minimum(down, up))           # (n_freq, n_mels)
    return fb.astype(np.float32)


def _create_dct_np(n_mfcc, n_mels, norm="ortho"):
    # torchaudio.functional.create_dct (DCT-II)
    n = np.arange(n_mels, dtype=np.float64)
    k = np.arange(n_mfcc, dtype=np.float64)[:, None]
    dct = np.cos(np.pi / n_mels * (n + 0.5) * k)         # (n_mfcc, n_mels)
    if norm is None:
        dct = dct * 2.0
    else:
        dct[0] *= 1.0 / math.sqrt(2.0)
        dct *= math.sqrt(2.0 / n_mels)
    return dct.T.astype(np.float32)                      # (n_mels, n_mfcc)


def _build_constants():
    window = _hann_window_np(WIN_LENGTH)                  # (n_fft,)
    n = np.arange(N_FFT, dtype=np.float64)
    k = np.arange(N_FREQ, dtype=np.float64)
    ang = 2.0 * np.pi * np.outer(n, k) / N_FFT            # (n_fft, n_freq)
    cos_w = (np.cos(ang) * window[:, None]).astype(np.float32)
    sin_w = (-np.sin(ang) * window[:, None]).astype(np.float32)

    # Fused DFT weight: each half zero-padded to N_FREQ_PAD lanes, then concatenated.
    cos_p = np.zeros((N_FFT, N_FREQ_PAD), np.float32)
    sin_p = np.zeros((N_FFT, N_FREQ_PAD), np.float32)
    cos_p[:, :N_FREQ] = cos_w
    sin_p[:, :N_FREQ] = sin_w
    w_fused = np.concatenate([cos_p, sin_p], axis=1)      # (n_fft, 2*N_FREQ_PAD)

    fb = _mel_fbanks_np(N_FREQ, 0.0, SAMPLE_RATE / 2.0, N_MELS, SAMPLE_RATE)
    fb_pad = np.zeros((N_FREQ_PAD, N_MELS), np.float32)   # zero rows kill padded bins
    fb_pad[:N_FREQ, :] = fb

    dct = _create_dct_np(N_MFCC, N_MELS, norm="ortho")    # (n_mels, n_mfcc)
    dct_pad = np.zeros((N_MELS, N_MFCC_PAD), np.float32)
    dct_pad[:, :N_MFCC] = dct
    dct_t_pad = np.ascontiguousarray(dct_pad.T)           # (n_mfcc_pad, n_mels)
    return w_fused, fb_pad, dct_t_pad


W_FUSED, FB_PAD, DCT_T_PAD = _build_constants()


# ----------------------------- Pallas kernels -------------------------------
def mel_db_kernel(frames_ref, w_ref, fb_ref, db_ref, max_ref,
                  *, n_frames_valid, tile_f, n_freq_pad):
    # frames_ref: (1, TF, n_fft)   w_ref: (n_fft, 2*n_freq_pad)   fb_ref: (n_freq_pad, n_mels)
    frames = frames_ref[0]                                               # (TF, n_fft)
    y = jnp.dot(frames, w_ref[...], preferred_element_type=jnp.float32)  # (TF, 2*nfp)
    re = y[:, :n_freq_pad]                                               # 256-lane aligned slice
    im = y[:, n_freq_pad:]
    power = re * re + im * im                                            # (TF, n_freq_pad)
    mel = jnp.dot(power, fb_ref[...], preferred_element_type=jnp.float32)  # (TF, n_mels)
    # AmplitudeToDB ('power'): 10*log10(clamp(x, amin)) - 10*db_multiplier(=0)
    db = 10.0 * jnp.log10(jnp.maximum(mel, AMIN))
    db_ref[0] = db

    # Per-tile partial max (padded frame rows masked out) -> avoids re-reading db in XLA.
    row = jax.lax.broadcasted_iota(jnp.int32, db.shape, 0) + pl.program_id(1) * tile_f
    masked = jnp.where(row < n_frames_valid, db, jnp.float32(-3.4e38))
    per_lane = jnp.max(masked, axis=0, keepdims=True)                    # (1, n_mels)
    max_ref[...] = per_lane.reshape(1, 1, 1, db.shape[1])


def dct_kernel(thr_ref, db_ref, dct_t_ref, out_ref):
    # thr_ref: (1,) SMEM   db_ref: (1, TF, n_mels)   dct_t_ref: (n_mfcc_pad, n_mels)
    x = jnp.maximum(db_ref[0], thr_ref[0])                               # top_db clamp, (TF, n_mels)
    # out[k, t] = sum_m dct[m, k] * x[t, m]  -> transposed, lane-dense (n_mfcc_pad, TF) block
    out_ref[0] = jax.lax.dot_general(
        dct_t_ref[...], x,
        dimension_numbers=(((1,), (1,)), ((), ())),
        preferred_element_type=jnp.float32)


# ------------------------------ wrappers -------------------------------------
def _mel_db(frames, w_fused, fb_pad, tile_f, n_frames_valid):
    B, f_pad, n_fft = frames.shape
    n_tiles = f_pad // tile_f
    n_freq_pad, n_mels = fb_pad.shape
    two_nf = w_fused.shape[1]
    kernel = functools.partial(mel_db_kernel, n_frames_valid=n_frames_valid,
                               tile_f=tile_f, n_freq_pad=n_freq_pad)
    return pl.pallas_call(
        kernel,
        out_shape=(
            jax.ShapeDtypeStruct((B, f_pad, n_mels), jnp.float32),
            jax.ShapeDtypeStruct((B, n_tiles, 1, n_mels), jnp.float32),
        ),
        grid=(B, n_tiles),
        in_specs=[
            pl.BlockSpec((1, tile_f, n_fft), lambda b, f: (b, f, 0)),
            pl.BlockSpec((n_fft, two_nf), lambda b, f: (0, 0)),
            pl.BlockSpec((n_freq_pad, n_mels), lambda b, f: (0, 0)),
        ],
        out_specs=(
            pl.BlockSpec((1, tile_f, n_mels), lambda b, f: (b, f, 0)),
            pl.BlockSpec((1, 1, 1, n_mels), lambda b, f: (b, f, 0, 0)),
        ),
        compiler_params=pltpu.CompilerParams(
            dimension_semantics=("parallel", "parallel")),
    )(frames, w_fused, fb_pad)


def _dct_apply(db, thr, dct_t_pad, tile_f):
    B, f_pad, n_mels = db.shape
    n_tiles = f_pad // tile_f
    n_mfcc_pad = dct_t_pad.shape[0]
    return pl.pallas_call(
        dct_kernel,
        out_shape=jax.ShapeDtypeStruct((B, n_mfcc_pad, f_pad), jnp.float32),
        grid=(B, n_tiles),
        in_specs=[
            pl.BlockSpec(memory_space=pltpu.MemorySpace.SMEM),           # thr scalar
            pl.BlockSpec((1, tile_f, n_mels), lambda b, f: (b, f, 0)),
            pl.BlockSpec((n_mfcc_pad, n_mels), lambda b, f: (0, 0)),
        ],
        out_specs=pl.BlockSpec((1, n_mfcc_pad, tile_f), lambda b, f: (b, 0, f)),
        compiler_params=pltpu.CompilerParams(
            dimension_semantics=("parallel", "parallel")),
    )(thr, db, dct_t_pad)


def _round_up(x, m):
    return ((x + m - 1) // m) * m


def _frame_signal(waveform, n_fft, hop):
    # center=False (forced by ConvertibleMelSpectrogram), pad=0
    B, T = waveform.shape
    n_frames = (T - n_fft) // hop + 1
    if n_fft == 2 * hop:
        # Overlap framing via reshape + shifted concat (no XLA gather):
        # frame f = chunks[f] ++ chunks[f+1] with hop-sized chunks.
        c = waveform[:, : (n_frames + 1) * hop].reshape(B, n_frames + 1, hop)
        frames = jnp.concatenate([c[:, :-1, :], c[:, 1:, :]], axis=-1)   # (B, F, n_fft)
    else:
        idx = jnp.arange(n_frames)[:, None] * hop + jnp.arange(n_fft)[None, :]
        frames = waveform[:, idx]
    return frames, n_frames


def convertible_mfcc(waveform):
    """waveform: (B, time) float32  ->  mfcc: (B, n_mfcc, n_frames) float32."""
    waveform = waveform.astype(jnp.float32)
    frames, n_frames = _frame_signal(waveform, N_FFT, HOP_LENGTH)        # (B, F, n_fft)

    # Frame-tile selection: multiple of 8, capped at TILE_F_MAX (sized for v7x's 64 MiB
    # VMEM with f32 double-buffered blocks); pad F to a tile multiple (zeros -> masked).
    f8 = _round_up(n_frames, 8)
    tile_f = f8 if f8 <= TILE_F_MAX else TILE_F_MAX
    f_pad = _round_up(f8, tile_f)
    if f_pad != n_frames:
        frames = jnp.pad(frames, ((0, 0), (0, f_pad - n_frames), (0, 0)))

    db, blk_max = _mel_db(frames, W_FUSED, FB_PAD, tile_f, n_frames)     # (B,F_pad,128), (B,nt,1,128)

    # AmplitudeToDB top_db clamp: global max over the whole (B, n_mels, time) tensor
    # (matches torchaudio for 3-D input), computed from the tiny per-tile maxima.
    thr = jnp.reshape(jnp.max(blk_max) - TOP_DB, (1,))

    mfcc_t = _dct_apply(db, thr, DCT_T_PAD, tile_f)                      # (B, 128, F_pad)
    return mfcc_t[:, :N_MFCC, :n_frames]                                 # (B, n_mfcc, time)


if __name__ == "__main__":
    key = jax.random.PRNGKey(0)
    B = 2
    n_frames = 8
    T = (n_frames - 1) * HOP_LENGTH + N_FFT               # 1152 samples
    waveform = jax.random.normal(key, (B, T), dtype=jnp.float32)

    out = jax.jit(convertible_mfcc)(waveform)
    out = jax.block_until_ready(out)
    assert out.shape == (B, N_MFCC, n_frames), out.shape
    assert out.dtype == jnp.float32
    assert bool(jnp.all(jnp.isfinite(out)))
    print("KERNEL_OK")
</pallas_src>

<mosaic_0001>
module attributes {stable_mosaic.version = 11 : i64} {
  func.func @mel_db_kernel(%arg0: i32, %arg1: i32, %arg2: memref<1x8x256xf32, #tpu.memory_space<vmem>>, %arg3: memref<256x512xf32, #tpu.memory_space<vmem>>, %arg4: memref<256x128xf32, #tpu.memory_space<vmem>>, %arg5: memref<1x8x128xf32, #tpu.memory_space<vmem>>, %arg6: memref<1x1x1x128xf32, #tpu.memory_space<vmem>>) attributes {dimension_semantics = [#tpu.dimension_semantics<parallel>, #tpu.dimension_semantics<parallel>], iteration_bounds = array<i64: 2, 1>, scalar_prefetch = 0 : i64, scratch_operands = 0 : i64, tpu.core_type = #tpu.core_type<tc>, window_params = [{transform_indices = @transform_0, window_bounds = array<i64: 1, 8, 256>}, {pipeline_mode = #tpu.pipeline_mode<synchronous>, transform_indices = @transform_1, window_bounds = array<i64: 256, 512>}, {pipeline_mode = #tpu.pipeline_mode<synchronous>, transform_indices = @transform_2, window_bounds = array<i64: 256, 128>}, {transform_indices = @transform_3, window_bounds = array<i64: 1, 8, 128>}, {transform_indices = @transform_4, window_bounds = array<i64: 1, 1, 1, 128>}]} {
    %c0 = arith.constant 0 : index
    %c0_0 = arith.constant 0 : index
    %c0_1 = arith.constant 0 : index
    %0 = vector.load %arg2[%c0, %c0_0, %c0_1] : memref<1x8x256xf32, #tpu.memory_space<vmem>>, vector<1x8x256xf32>
    %1 = vector.shape_cast %0 : vector<1x8x256xf32> to vector<8x256xf32>
    %c0_2 = arith.constant 0 : index
    %c0_3 = arith.constant 0 : index
    %2 = vector.load %arg3[%c0_2, %c0_3] : memref<256x512xf32, #tpu.memory_space<vmem>>, vector<256x512xf32>
    %cst = arith.constant dense<0.000000e+00> : vector<8x512xf32>
    %3 = tpu.matmul %1, %2, %cst {dimension_numbers = #tpu.dot_dimension_numbers<[1], [0], [0], [1], [0, 0, 1, 1], [], []>} : vector<8x256xf32>, vector<256x512xf32>, vector<8x512xf32> -> vector<8x512xf32>
    %4 = vector.extract_strided_slice %3 {offsets = [0, 0], sizes = [8, 256], strides = [1, 1]} : vector<8x512xf32> to vector<8x256xf32>
    %5 = vector.extract_strided_slice %3 {offsets = [0, 256], sizes = [8, 256], strides = [1, 1]} : vector<8x512xf32> to vector<8x256xf32>
    %6 = arith.mulf %4, %4 : vector<8x256xf32>
    %7 = arith.mulf %5, %5 : vector<8x256xf32>
    %8 = arith.addf %6, %7 : vector<8x256xf32>
    %c0_4 = arith.constant 0 : index
    %c0_5 = arith.constant 0 : index
    %9 = vector.load %arg4[%c0_4, %c0_5] : memref<256x128xf32, #tpu.memory_space<vmem>>, vector<256x128xf32>
    %cst_6 = arith.constant dense<0.000000e+00> : vector<8x128xf32>
    %10 = tpu.matmul %8, %9, %cst_6 {dimension_numbers = #tpu.dot_dimension_numbers<[1], [0], [0], [1], [0, 0, 1, 1], [], []>} : vector<8x256xf32>, vector<256x128xf32>, vector<8x128xf32> -> vector<8x128xf32>
    %cst_7 = arith.constant 1.000000e-10 : f32
    %11 = vector.broadcast %cst_7 : f32 to vector<8x128xf32>
    %12 = arith.maximumf %10, %11 : vector<8x128xf32>
    %13 = math.log %12 : vector<8x128xf32>
    %cst_8 = arith.constant 0.434294492 : f32
    %14 = vector.broadcast %cst_8 : f32 to vector<8x128xf32>
    %15 = arith.mulf %13, %14 : vector<8x128xf32>
    %cst_9 = arith.constant 1.000000e+01 : f32
    %16 = vector.broadcast %cst_9 : f32 to vector<8x128xf32>
    %17 = arith.mulf %16, %15 : vector<8x128xf32>
    %c0_10 = arith.constant 0 : index
    %c0_11 = arith.constant 0 : index
    %c0_12 = arith.constant 0 : index
    %18 = vector.load %arg5[%c0_10, %c0_11, %c0_12] : memref<1x8x128xf32, #tpu.memory_space<vmem>>, vector<1x8x128xf32>
    %19 = vector.shape_cast %18 : vector<1x8x128xf32> to vector<8x128xf32>
    %20 = vector.shape_cast %17 : vector<8x128xf32> to vector<1x8x128xf32>
    tpu.vector_store %arg5[%c0_10, %c0_11, %c0_12], %20 {strides = array<i32>} : memref<1x8x128xf32, #tpu.memory_space<vmem>>, vector<1x8x128xf32>,
    %21 = tpu.iota {dimensions = array<i32: 0>} : vector<8x128xi32>
    %c8_i32 = arith.constant 8 : i32
    %22 = arith.muli %arg1, %c8_i32 : i32
    %23 = vector.broadcast %22 : i32 to vector<8x128xi32>
    %24 = arith.addi %21, %23 : vector<8x128xi32>
    %c8_i32_13 = arith.constant 8 : i32
    %25 = vector.broadcast %c8_i32_13 : i32 to vector<8x128xi32>
    %26 = arith.cmpi slt, %24, %25 : vector<8x128xi32>
    %cst_14 = arith.constant -3.400000e+38 : f32
    %27 = vector.broadcast %cst_14 : f32 to vector<8x128xf32>
    %28 = arith.select %26, %17, %27 : vector<8x128xi1>, vector<8x128xf32>
    %cst_15 = arith.constant dense<0xFF800000> : vector<128xf32>
    %29 = vector.multi_reduction <maximumf>, %28, %cst_15 [0] : vector<8x128xf32> to vector<128xf32>
    %30 = vector.shape_cast %29 : vector<128xf32> to vector<1x128xf32>
    %31 = vector.shape_cast %30 : vector<1x128xf32> to vector<1x1x1x128xf32>
    %c0_16 = arith.constant 0 : index
    %c0_17 = arith.constant 0 : index
    %c0_18 = arith.constant 0 : index
    %c0_19 = arith.constant 0 : index
    %32 = vector.load %arg6[%c0_16, %c0_17, %c0_18, %c0_19] : memref<1x1x1x128xf32, #tpu.memory_space<vmem>>, vector<1x1x1x128xf32>
    tpu.vector_store %arg6[%c0_16, %c0_17, %c0_18, %c0_19], %31 {strides = array<i32>} : memref<1x1x1x128xf32, #tpu.memory_space<vmem>>, vector<1x1x1x128xf32>,
    return
  }
  func.func @transform_0(%arg0: i32, %arg1: i32) -> (i32, i32, i32) {
    %c0_i32 = arith.constant 0 : i32
    %c0_i32_0 = arith.constant 0 : i32
    return %arg0, %arg1, %c0_i32 : i32, i32, i32
  }
  func.func @transform_1(%arg0: i32, %arg1: i32) -> (i32, i32) {
    %c0_i32 = arith.constant 0 : i32
    %c0_i32_0 = arith.constant 0 : i32
    %c0_i32_1 = arith.constant 0 : i32
    return %c0_i32, %c0_i32_0 : i32, i32
  }
  func.func @transform_2(%arg0: i32, %arg1: i32) -> (i32, i32) {
    %c0_i32 = arith.constant 0 : i32
    %c0_i32_0 = arith.constant 0 : i32
    %c0_i32_1 = arith.constant 0 : i32
    return %c0_i32, %c0_i32_0 : i32, i32
  }
  func.func @transform_3(%arg0: i32, %arg1: i32) -> (i32, i32, i32) {
    %c0_i32 = arith.constant 0 : i32
    %c0_i32_0 = arith.constant 0 : i32
    return %arg0, %arg1, %c0_i32 : i32, i32, i32
  }
  func.func @transform_4(%arg0: i32, %arg1: i32) -> (i32, i32, i32, i32) {
    %c0_i32 = arith.constant 0 : i32
    %c0_i32_0 = arith.constant 0 : i32
    %c0_i32_1 = arith.constant 0 : i32
    return %arg0, %arg1, %c0_i32, %c0_i32_0 : i32, i32, i32, i32
  }
}

module attributes {stable_mosaic.version = 11 : i64} {
  func.func @dct_kernel(%arg0: i32, %arg1: i32, %arg2: memref<1xf32, #tpu.memory_space<smem>>, %arg3: memref<1x8x128xf32, #tpu.memory_space<vmem>>, %arg4: memref<128x128xf32, #tpu.memory_space<vmem>>, %arg5: memref<1x128x8xf32, #tpu.memory_space<vmem>>) attributes {dimension_semantics = [#tpu.dimension_semantics<parallel>, #tpu.dimension_semantics<parallel>], iteration_bounds = array<i64: 2, 1>, scalar_prefetch = 0 : i64, scratch_operands = 0 : i64, tpu.core_type = #tpu.core_type<tc>, window_params = [{transform_indices = @transform_0, window_bounds = array<i64: 1>}, {transform_indices = @transform_1, window_bounds = array<i64: 1, 8, 128>}, {pipeline_mode = #tpu.pipeline_mode<synchronous>, transform_indices = @transform_2, window_bounds = array<i64: 128, 128>}, {transform_indices = @transform_3, window_bounds = array<i64: 1, 128, 8>}]} {
    %c0 = arith.constant 0 : index
    %c0_0 = arith.constant 0 : index
    %c0_1 = arith.constant 0 : index
    %0 = vector.load %arg3[%c0, %c0_0, %c0_1] : memref<1x8x128xf32, #tpu.memory_space<vmem>>, vector<1x8x128xf32>
    %1 = vector.shape_cast %0 : vector<1x8x128xf32> to vector<8x128xf32>
    %c0_2 = arith.constant 0 : index
    %2 = memref.load %arg2[%c0_2] : memref<1xf32, #tpu.memory_space<smem>>
    %3 = vector.broadcast %2 : f32 to vector<8x128xf32>
    %4 = arith.maximumf %1, %3 : vector<8x128xf32>
    %c0_3 = arith.constant 0 : index
    %c0_4 = arith.constant 0 : index
    %5 = vector.load %arg4[%c0_3, %c0_4] : memref<128x128xf32, #tpu.memory_space<vmem>>, vector<128x128xf32>
    %cst = arith.constant dense<0.000000e+00> : vector<128x8xf32>
    %6 = tpu.matmul %5, %4, %cst {dimension_numbers = #tpu.dot_dimension_numbers<[1], [1], [0], [0], [0, 0, 1, 0], [], []>} : vector<128x128xf32>, vector<8x128xf32>, vector<128x8xf32> -> vector<128x8xf32>
    %c0_5 = arith.constant 0 : index
    %c0_6 = arith.constant 0 : index
    %c0_7 = arith.constant 0 : index
    %7 = vector.load %arg5[%c0_5, %c0_6, %c0_7] : memref<1x128x8xf32, #tpu.memory_space<vmem>>, vector<1x128x8xf32>
    %8 = vector.shape_cast %7 : vector<1x128x8xf32> to vector<128x8xf32>
    %9 = vector.shape_cast %6 : vector<128x8xf32> to vector<1x128x8xf32>
    tpu.vector_store %arg5[%c0_5, %c0_6, %c0_7], %9 {strides = array<i32>} : memref<1x128x8xf32, #tpu.memory_space<vmem>>, vector<1x128x8xf32>,
    return
  }
  func.func @transform_0(%arg0: i32, %arg1: i32) -> i32 {
    %c0_i32 = arith.constant 0 : i32
    %c0_i32_0 = arith.constant 0 : i32
    return %c0_i32 : i32
  }
  func.func @transform_1(%arg0: i32, %arg1: i32) -> (i32, i32, i32) {
    %c0_i32 = arith.constant 0 : i32
    %c0_i32_0 = arith.constant 0 : i32
    return %arg0, %arg1, %c0_i32 : i32, i32, i32
  }
  func.func @transform_2(%arg0: i32, %arg1: i32) -> (i32, i32) {
    %c0_i32 = arith.constant 0 : i32
    %c0_i32_0 = arith.constant 0 : i32
    %c0_i32_1 = arith.constant 0 : i32
    return %c0_i32, %c0_i32_0 : i32, i32
  }
  func.func @transform_3(%arg0: i32, %arg1: i32) -> (i32, i32, i32) {
    %c0_i32 = arith.constant 0 : i32
    %c0_i32_0 = arith.constant 0 : i32
    return %arg0, %c0_i32, %arg1 : i32, i32, i32
  }
}

</mosaic_0001>

<bundles_post_ra>
// kernel: convertible_mfcc.3
= control target key start
LH: loop header
LB: loop body
LE: loop exit
PB: predicated region body
PF: predicated region fallthrough
CT: control target
= control target key end

     0   :  { %s589_s14 = smov 0   ;;  %s591_s15 = smov 0   ;;  %s708_s0 = inlined_call_operand.<no memory space> [shape: f32[1], index: 0, kind: input, shape index: {}]   ;;  %s709_s1 = inlined_call_operand.vmem [shape: f32[2,8,128], index: 1, kind: input, shape index: {}]   ;;  %s710_s2 = inlined_call_operand.vmem [shape: f32[128,128], index: 2, kind: input, shape index: {}]   ;;  %s711_s3 = inlined_call_operand.vmem [shape: f32[2,128,8], index: 3, kind: output, shape index: {}]  }
   0x1   :  { %8 = sst [smem:[#allocation2]] %s708_s0  ;;  %s593_s16 = smov 0  }
   0x2 LB: > { %s26_s0 = sadd.s32 1, %s560_s15  ;;  %p466_p0 = scmp.ge.s32.totalorder %s564_s16, 1  ;;  %s564_s16 = sphi %s593_s16, %s14_s16   ;;  %s560_s15 = sphi %s591_s15, %s713_s15   ;;  %s556_s14 = sphi %s589_s14, %s712_s14  }
   0x3   : > { %p28_p1 = scmp.ge.s32.totalorder %s26_s0, 2  ;;  %p156_p2 = scmp.lt.s32.totalorder %s564_s16, 3 }
   0x5   : > { %s715_s0 = smov (%p28_p1, %s26_s0), 0  ;;  %p157_p3 = pnand %p466_p0, %p156_p2 }
   0x6   : > { %p185_p4 = scmp.lt.s32.totalorder (!%p157_p3), %s556_s14, 1  ;;  %s201_s17 = sld [smem:[#allocation2]] (!%p157_p3)  ;;  %v204_v0 = vld [vmem:[%s710_s2] sm:$0xff] (!%p157_p3)  ;;  %v205_v5 = vld [vmem:[%s710_s2 + $0x8] sm:$0xff] (!%p157_p3)  ;;  %v206_v7 = vld [vmem:[%s710_s2 + $0x10] sm:$0xff] (!%p157_p3)  ;;  %vm365_vm0 = vcmask (!%p157_p3), 64512  }
   0x7   : > { %160 = sbr.rel (%p157_p3) target bundleno = 250 (0xfa), region = 32  ;;  %v212_v1 = vld [vmem:[%s710_s2 + $0x40] sm:$0xff] (!%p157_p3)  ;;  %492 = vmatprep.mubr.f32.mxu0 (!%p157_p3), %v204_v0  ;;  %v213_v6 = vld [vmem:[%s710_s2 + $0x48] sm:$0xff] (!%p157_p3)  ;;  %v214_v8 = vld [vmem:[%s710_s2 + $0x50] sm:$0xff] (!%p157_p3) }
   0x8   : > { %504 = vmatprep.mubr.f32.mxu1 (!%p157_p3), %v212_v1  ;;  %v207_v9 = vld [vmem:[%s710_s2 + $0x18] sm:$0xff] (!%p157_p3)  ;;  %v208_v11 = vld [vmem:[%s710_s2 + $0x20] sm:$0xff] (!%p157_p3)  ;;  %v209_v13 = vld [vmem:[%s710_s2 + $0x28] sm:$0xff] (!%p157_p3) }
   0x9   : > { %v215_v10 = vld [vmem:[%s710_s2 + $0x58] sm:$0xff] (!%p157_p3)  ;;  %v216_v12 = vld [vmem:[%s710_s2 + $0x60] sm:$0xff] (!%p157_p3)  ;;  %v217_v14 = vld [vmem:[%s710_s2 + $0x68] sm:$0xff] (!%p157_p3) }
   0xa   : > { %v210_v15 = vld [vmem:[%s710_s2 + $0x30] sm:$0xff] (!%p157_p3)  ;;  %v211_v17 = vld [vmem:[%s710_s2 + $0x38] sm:$0xff] (!%p157_p3) }
   0xb   : > { %v218_v16 = vld [vmem:[%s710_s2 + $0x70] sm:$0xff] (!%p157_p3)  ;;  %v219_v18 = vld [vmem:[%s710_s2 + $0x78] sm:$0xff] (!%p157_p3) }
   0xc   : > { %v202_v3 = vstv (!%p157_p3), %s201_s17 }
   0xe   : > { %s717_s14 = smov (!%p185_p4, %s556_s14), 1 }
   0xf   : > { %s467_s22 = sshll.u32 %s717_s14, 3  ;;  %s472_s30 = sshll.u32 %s717_s14, 7 }
  0x10   : > { %s191_s25 = scalar_lea.vmem %s709_s1, %s467_s22  ;;  %s665_s6 = scalar_lea.vmem %s711_s3, %s472_s30 }
  0x11   : > { %v200_v2 = vld [vmem:[%s191_s25] sm:$0xff] }
  0x12   : > { %v203_v4 = vmax.f32 %v200_v2, %v202_v3 }
  0x14   : > { %490 = vmatprep.subr.mxu0 %v203_v4  ;;  %516 = vmatprep.subr.mxu1 %v203_v4 }
  0x15   : > { %491 = vmatpush3.xpose.msra.mxu0 %v203_v4  ;;  %517 = vmatpush3.xpose.msra.mxu1 %v203_v4 }
  0x18   : > { %493 = vmatmul.mubr.f32.vlgmr.msra.gmra.mrb[0].mxu0 %v205_v5  ;;  %505 = vmatmul.mubr.f32.vlgmr.msra.gmra.mrb[0].mxu1 %v213_v6 }
  0x19   : > { %495 = vmatprep.mubr.f32.mxu0 %v206_v7  ;;  %507 = vmatprep.mubr.f32.mxu1 %v214_v8 }
  0x1c   : > { %496 = vmatmul.mubr.f32.gmra.mrb[2].mxu0 %v207_v9  ;;  %508 = vmatmul.mubr.f32.gmra.mrb[2].mxu1 %v215_v10 }
  0x1d   : > { %498 = vmatprep.mubr.f32.mxu0 %v208_v11  ;;  %510 = vmatprep.mubr.f32.mxu1 %v216_v12 }
  0x20   : > { %499 = vmatmul.mubr.f32.gmra.mrb[4].mxu0 %v209_v13  ;;  %511 = vmatmul.mubr.f32.gmra.mrb[4].mxu1 %v217_v14 }
  0x21   : > { %501 = vmatprep.mubr.f32.mxu0 %v210_v15  ;;  %513 = vmatprep.mubr.f32.mxu1 %v218_v16 }
  0x24   : > { %502 = vmatmul.mubr.f32.gmra.mrb[6].mxu0 %v211_v17  ;;  %514 = vmatmul.mubr.f32.gmra.mrb[6].mxu1 %v219_v18 }
  0xeb   : > { %v494_v19 = vpop.f32.mrb[0].mxu0  ;;  %v506_v20 = vpop.f32.mrb[0].mxu1 }
  0xec   : > { %367 = vst.msk [vmem:[%s665_s6 + $0x8] sm:$0xff] %vm365_vm0, %v494_v19  ;;  %375 = vst.msk [vmem:[%s665_s6 + $0x48] sm:$0xff] %vm365_vm0, %v506_v20  ;;  %v286_v21 = vpop.f32.mrb[1].mxu0  ;;  %v326_v22 = vpop.f32.mrb[1].mxu1 }
  0xed   : > { %366 = vst.msk [vmem:[%s665_s6] sm:$0xff] %vm365_vm0, %v286_v21  ;;  %374 = vst.msk [vmem:[%s665_s6 + $0x40] sm:$0xff] %vm365_vm0, %v326_v22 }
  0xef   : > { %v497_v23 = vpop.f32.mrb[2].mxu0  ;;  %v509_v24 = vpop.f32.mrb[2].mxu1 }
  0xf0   : > { %369 = vst.msk [vmem:[%s665_s6 + $0x18] sm:$0xff] %vm365_vm0, %v497_v23  ;;  %377 = vst.msk [vmem:[%s665_s6 + $0x58] sm:$0xff] %vm365_vm0, %v509_v24  ;;  %v296_v25 = vpop.f32.mrb[3].mxu0  ;;  %v336_v26 = vpop.f32.mrb[3].mxu1 }
  0xf1   : > { %368 = vst.msk [vmem:[%s665_s6 + $0x10] sm:$0xff] %vm365_vm0, %v296_v25  ;;  %376 = vst.msk [vmem:[%s665_s6 + $0x50] sm:$0xff] %vm365_vm0, %v336_v26 }
  0xf3   : > { %v500_v27 = vpop.f32.mrb[4].mxu0  ;;  %v512_v28 = vpop.f32.mrb[4].mxu1 }
  0xf4   : > { %371 = vst.msk [vmem:[%s665_s6 + $0x28] sm:$0xff] %vm365_vm0, %v500_v27  ;;  %379 = vst.msk [vmem:[%s665_s6 + $0x68] sm:$0xff] %vm365_vm0, %v512_v28  ;;  %v306_v29 = vpop.f32.mrb[5].mxu0  ;;  %v346_v30 = vpop.f32.mrb[5].mxu1 }
  0xf5   : > { %370 = vst.msk [vmem:[%s665_s6 + $0x20] sm:$0xff] %vm365_vm0, %v306_v29  ;;  %378 = vst.msk [vmem:[%s665_s6 + $0x60] sm:$0xff] %vm365_vm0, %v346_v30 }
  0xf7   : > { %v503_v31 = vpop.f32.mrb[6].mxu0  ;;  %v515_v32 = vpop.f32.mrb[6].mxu1 }
  0xf8   : > { %373 = vst.msk [vmem:[%s665_s6 + $0x38] sm:$0xff] %vm365_vm0, %v503_v31  ;;  %381 = vst.msk [vmem:[%s665_s6 + $0x78] sm:$0xff] %vm365_vm0, %v515_v32  ;;  %v316_v33 = vpop.f32.mrb[7].mxu0  ;;  %v356_v34 = vpop.f32.mrb[7].mxu1 }
  0xf9   : > { %372 = vst.msk [vmem:[%s665_s6 + $0x30] sm:$0xff] %vm365_vm0, %v316_v33  ;;  %380 = vst.msk [vmem:[%s665_s6 + $0x70] sm:$0xff] %vm365_vm0, %v356_v34 }
  0xfa PF: > { %s14_s16 = sadd.s32 1, %s564_s16   ;;  %s712_s14 = smov %s560_s15 }
  0xfb   : > { %p11_p5 = scmp.ge.s32.totalorder %s14_s16, 4   ;;  %s713_s15 = smov %s715_s0 }
  0xfd   :  { %13 = sbr.rel (!%p11_p5) target bundleno = 2 (0x2), region = 62 }

// kernel: convertible_mfcc.2
= control target key start
LH: loop header
LB: loop body
LE: loop exit
PB: predicated region body
PF: predicated region fallthrough
CT: control target
= control target key end

     0   :  { %10 = vsyncpa [#allocation3], 0  ;;  %s1322_s0 = inlined_call_operand.vmem [shape: f32[2,8,256], index: 0, kind: input, shape index: {}]   ;;  %s1323_s1 = inlined_call_operand.hbm [shape: f32[256,512], index: 1, kind: input, shape index: {}]   ;;  %s1324_s2 = inlined_call_operand.hbm [shape: f32[256,128], index: 2, kind: input, shape index: {}]   ;;  %s1325_s3 = inlined_call_operand.vmem [shape: f32[2,8,128], index: 3, kind: output, shape index: {0}]   ;;  %s1326_s4 = inlined_call_operand.vmem [shape: f32[2,1,1,128], index: 4, kind: output, shape index: {1}]  }
   0x1   :  { %11 = vsyncpa [#allocation5], 0  ;;  %s1195_s15 = smov 0   ;;  %s1197_s16 = smov 0  }
   0x2   :  { %s1199_s17 = smov 0  }
   0x3 LB: > { %s815_s18 = sadd.s32 4294967295, %s1162_s17   ;;  %s29_s19 = sadd.s32 1, %s1158_s16  ;;  %s1162_s17 = sphi %s1199_s17, %s17_s17   ;;  %s1158_s16 = sphi %s1197_s16, %s1336_s16   ;;  %s1154_s15 = sphi %s1195_s15, %s1335_s15  }
   0x4   : > { %p31_p0 = scmp.ge.s32.totalorder %s29_s19, 2  ;;  %p817_p1 = scmp.ge.s32.totalorder %s1162_s17, 1 }
   0x5   : > { %p160_p2 = scmp.lt.s32.totalorder %s1162_s17, 3  ;;  %p1220_p4 = scmp.eq.s32.totalorder %s815_s18, 0 }
   0x6   : > { %s1338_s19 = smov (%p31_p0, %s29_s19), 0  ;;  %s1164_s22 = smov [#allocation2]  }
   0x7   : > { %p1216_p3 = pnand %p817_p1, %p160_p2  ;;  %s172_s23 = sshll.u32 %s1164_s22, 4  ;;  %s173_s23 = int_to_ptr.vmem [resolvable:$true] %s172_s23 }
   0x8   : > { %s1331_s21 = scalar_select %p1220_p4, 1, 0 }
   0x9   : > { %s1330_s20 = scalar_select %p1216_p3, 1, 0 }
   0xa   : > { %p1033_p5 = pneg %p1216_p3  ;;  %s1165_s25 = smov [#allocation4]  }
   0xb   : > { %s185_s26 = sshll.u32 %s1165_s25, 4  ;;  %s1076_s29 = scalar_lea.hbm %s1323_s1, 16384  ;;  %s1232_s26 = int_to_ptr.vmem [resolvable:$true] %s185_s26 }
   0xc   : > { %p1228_p6 = pnand %p1220_p4, %p1033_p5  ;;  %p1077_p7 = scmp.ne.s32.totalorder %s1323_s1, %s1076_s29 }
   0xd   : > { %p1083_p11 = scmp.lt.u32.totalorder %s1076_s29, %s1323_s1 }
   0xe   : > { %p1078_p8 = pneg %p1228_p6 }
  0x10   : > { %p1079_p9 = pnand %p1078_p8, %p1077_p7 }
  0x12   : > { %p1080_p10 = pneg %p1079_p9 }
  0x14   : > { %p1085_p12 = pnand %p1083_p11, %p1080_p10 }
  0x16   : > { %1088 = shalt.err (!%p1085_p12)
}
  0x17   : > { %s1089_s8 = scalar_lea.vmem %s173_s23, 16384  ;;  %p1097_p2 = scmp.lt.s32.totalorder %s173_s23, %s173_s23 }
  0x18   : > { %p1090_p13 = scmp.ne.s32.totalorder %s173_s23, %s1089_s8  ;;  %p1098_p5 = scmp.lt.s32.totalorder %s1089_s8, %s1089_s8 }
  0x1a   : > { %p1092_p0 = pnand %p1090_p13, %p1078_p8  ;;  %p1099_p4 = por %p1098_p5, %p1097_p2 }
  0x1c   : > { %p1093_p1 = pneg %p1092_p0 }
  0x1e   : > { %p1100_p3 = pnand %p1099_p4, %p1093_p1 }
  0x20   : > { %1103 = shalt.err (!%p1100_p3)
}
  0x21   : > { %s1166_s9 = smov 512   ;;  %s1167_s10 = smov 32  }
  0x22   : > { %1036 = dma.hbm_to_vmem [thread:$0]  (!%p1228_p6), %s1323_s1, 16384, %s173_s23, [#allocation3], %s1166_s9, %s1166_s9, %s1167_s10  }
  0x23   : > { %s1104_s18 = scalar_lea.hbm %s1324_s2, 4096 }
  0x24   : > { %p1105_p7 = scmp.ne.s32.totalorder %s1324_s2, %s1104_s18  ;;  %p1111_p9 = scmp.lt.u32.totalorder %s1104_s18, %s1324_s2 }
  0x26   : > { %p1107_p3 = pnand %p1105_p7, %p1078_p8 }
  0x28   : > { %p1108_p4 = pneg %p1107_p3 }
  0x2a   : > { %p1113_p10 = pnand %p1111_p9, %p1108_p4 }
  0x2c   : > { %1116 = shalt.err (!%p1113_p10)
}
  0x2d   : > { %s1117_s23 = scalar_lea.vmem %s1232_s26, 4096  ;;  %p1125_p0 = scmp.lt.s32.totalorder %s1232_s26, %s1232_s26 }
  0x2e   : > { %p1118_p11 = scmp.ne.s32.totalorder %s1232_s26, %s1117_s23  ;;  %p1126_p1 = scmp.lt.s32.totalorder %s1117_s23, %s1117_s23 }
  0x30   : > { %p1120_p12 = pnand %p1118_p11, %p1078_p8  ;;  %p1127_p2 = por %p1126_p1, %p1125_p0 }
  0x32   : > { %p1121_p13 = pneg %p1120_p12 }
  0x34   : > { %p1128_p5 = pnand %p1127_p2, %p1121_p13 }
  0x36   : > { %1131 = shalt.err (!%p1128_p5)
}
  0x37   : > { %s1168_s29 = smov 128   ;;  %s1169_s30 = smov 8  }
  0x38   : > { %1039 = dma.hbm_to_vmem [thread:$0]  (!%p1228_p6), %s1324_s2, 4096, %s1232_s26, [#allocation5], %s1168_s29, %s1168_s29, %s1169_s30  }
  0x39   : > { %p1333_p7 = scmp.ne.s32.totalorder %s1330_s20, 0 }
  0x3a   : > { %p1334_p8 = scmp.ne.s32.totalorder (!%p1333_p7), %s1331_s21, 0 }
  0x3b   : > { %213 = sbr.rel (%p1333_p7) target bundleno = 603 (0x25b), region = 32 }
  0x42   : > { %1145 = dma.done.wait (%p1334_p8), [#allocation3], 16384  }
  0x43   : > { %1147 = vsyncadd (%p1334_p8), [#allocation3], 4294950912 }
  0x44   : > { %1149 = dma.done.wait (%p1334_p8), [#allocation5], 4096  }
  0x45   : > { %1151 = vsyncadd (%p1334_p8), [#allocation5], 4294963200  ;;  %v280_v0 = vld [vmem:[#allocation2 + $0x8] sm:$0xff]  ;;  %v282_v2 = vld [vmem:[#allocation2 + $0x18] sm:$0xff]  ;;  %p255_p6 = scmp.lt.s32.totalorder %s1154_s15, 1 }
  0x46   : > { %v284_v1 = vld [vmem:[#allocation2 + $0x28] sm:$0xff]  ;;  %v286_v4 = vld [vmem:[#allocation2 + $0x38] sm:$0xff]  ;;  %v279_v5 = vld [vmem:[#allocation2] sm:$0xff] }
  0x47   : > { %v865_v3 = vpack.c.bf16 %v284_v1, %v280_v0  ;;  %v283_v6 = vld [vmem:[#allocation2 + $0x20] sm:$0xff]  ;;  %v929_v7 = vpack.c.bf16 %v286_v4, %v282_v2  ;;  %v281_v9 = vld [vmem:[#allocation2 + $0x10] sm:$0xff]  ;;  %v288_v11 = vld [vmem:[#allocation2 + $0x48] sm:$0xff]  ;;  %s1340_s15 = smov (!%p255_p6, %s1154_s15), 1 }
  0x48   : > { %v867_v8 = vpack.c.bf16 %v283_v6, %v279_v5  ;;  %v285_v10 = vld [vmem:[#allocation2 + $0x30] sm:$0xff]  ;;  %v292_v13 = vld [vmem:[#allocation2 + $0x68] sm:$0xff]  ;;  %v290_v14 = vld [vmem:[#allocation2 + $0x58] sm:$0xff]  ;;  %s829_s20 = sshll.u32 %s1340_s15, 4  ;;  %s826_s7 = sshll.u32 %s1340_s15, 3 }
  0x49   : > { %866 = vmatprep.subr.bf16.mxu0 %v865_v3  ;;  %v931_v12 = vpack.c.bf16 %v285_v10, %v281_v9  ;;  %v294_v15 = vld [vmem:[#allocation2 + $0x78] sm:$0xff]  ;;  %930 = vmatprep.subr.bf16.mxu1 %v929_v7  ;;  %v869_v16 = vpack.c.bf16 %v292_v13, %v288_v11  ;;  %v287_v18 = vld [vmem:[#allocation2 + $0x40] sm:$0xff]  ;;  %v289_v20 = vld [vmem:[#allocation2 + $0x50] sm:$0xff]  ;;  %s1301_s26 = scalar_lea.vmem %s1322_s0, %s829_s20  ;;  %s270_s10 = scalar_lea.vmem %s1325_s3, %s826_s7 }
  0x4a   : > { %868 = vmatpush1.bf16.msra.mxu0 %v867_v8  ;;  %v933_v17 = vpack.c.bf16 %v294_v15, %v290_v14  ;;  %v291_v19 = vld [vmem:[#allocation2 + $0x60] sm:$0xff]  ;;  %v293_v22 = vld [vmem:[#allocation2 + $0x70] sm:$0xff]  ;;  %v296_v23 = vld [vmem:[#allocation2 + $0x88] sm:$0xff]  ;;  %s276_s13 = scalar_lea.vmem %s1326_s4, %s1340_s15 }
  0x4b   : > { %932 = vmatpush1.bf16.msra.mxu1 %v931_v12  ;;  %v871_v21 = vpack.c.bf16 %v291_v19, %v287_v18  ;;  %v300_v24 = vld [vmem:[#allocation2 + $0xa8] sm:$0xff]  ;;  %870 = vmatprep.subr.bf16.mxu0 %v869_v16  ;;  %v935_v25 = vpack.c.bf16 %v293_v22, %v289_v20  ;;  %v298_v27 = vld [vmem:[#allocation2 + $0x98] sm:$0xff]  ;;  %v295_v29 = vld [vmem:[#allocation2 + $0x80] sm:$0xff] }
  0x4c   : > { %934 = vmatprep.subr.bf16.mxu1 %v933_v17  ;;  %v873_v26 = vpack.c.bf16 %v300_v24, %v296_v23  ;;  %v302_v28 = vld [vmem:[#allocation2 + $0xb8] sm:$0xff]  ;;  %v299_v31 = vld [vmem:[#allocation2 + $0xa0] sm:$0xff]  ;;  %v297_v32 = vld [vmem:[#allocation2 + $0x90] sm:$0xff] }
  0x4d   : > { %v937_v30 = vpack.c.bf16 %v302_v28, %v298_v27  ;;  %v301_v33 = vld [vmem:[#allocation2 + $0xb0] sm:$0xff]  ;;  %v875_v34 = vpack.c.bf16 %v299_v31, %v295_v29  ;;  %v304_v35 = vld [vmem:[#allocation2 + $0xc8] sm:$0xff]  ;;  %v306_v37 = vld [vmem:[#allocation2 + $0xd8] sm:$0xff] }
  0x4e   : > { %872 = vmatpush1.bf16.msra.mxu0 %v871_v21  ;;  %v308_v36 = vld [vmem:[#allocation2 + $0xe8] sm:$0xff]  ;;  %v939_v38 = vpack.c.bf16 %v301_v33, %v297_v32  ;;  %v310_v40 = vld [vmem:[#allocation2 + $0xf8] sm:$0xff]  ;;  %v303_v41 = vld [vmem:[#allocation2 + $0xc0] sm:$0xff] }
  0x4f   : > { %936 = vmatpush1.bf16.msra.mxu1 %v935_v25  ;;  %874 = vmatprep.subr.bf16.mxu0 %v873_v26  ;;  %v877_v39 = vpack.c.bf16 %v308_v36, %v304_v35  ;;  %v307_v42 = vld [vmem:[#allocation2 + $0xe0] sm:$0xff]  ;;  %v941_v43 = vpack.c.bf16 %v310_v40, %v306_v37  ;;  %v305_v44 = vld [vmem:[#allocation2 + $0xd0] sm:$0xff]  ;;  %v312_v46 = vld [vmem:[#allocation2 + $0x108] sm:$0xff] }
  0x50   : > { %938 = vmatprep.subr.bf16.mxu1 %v937_v30  ;;  %v309_v45 = vld [vmem:[#allocation2 + $0xf0] sm:$0xff]  ;;  %v316_v47 = vld [vmem:[#allocation2 + $0x128] sm:$0xff]  ;;  %v314_v48 = vld [vmem:[#allocation2 + $0x118] sm:$0xff]  ;;  %v879_v50 = vpack.c.bf16 %v307_v42, %v303_v41 }
  0x51   : > { %v318_v49 = vld [vmem:[#allocation2 + $0x138] sm:$0xff]  ;;  %v943_v51 = vpack.c.bf16 %v309_v45, %v305_v44  ;;  %v881_v52 = vpack.c.bf16 %v316_v47, %v312_v46  ;;  %v311_v53 = vld [vmem:[#allocation2 + $0x100] sm:$0xff]  ;;  %v313_v55 = vld [vmem:[#allocation2 + $0x110] sm:$0xff] }
  0x52   : > { %876 = vmatpush1.bf16.msra.mxu0 %v875_v34  ;;  %v315_v54 = vld [vmem:[#allocation2 + $0x120] sm:$0xff]  ;;  %v945_v56 = vpack.c.bf16 %v318_v49, %v314_v48  ;;  %v317_v57 = vld [vmem:[#allocation2 + $0x130] sm:$0xff]  ;;  %v320_v58 = vld [vmem:[#allocation2 + $0x148] sm:$0xff] }
  0x53   : > { %940 = vmatpush1.bf16.msra.mxu1 %v939_v38  ;;  %878 = vmatprep.subr.bf16.mxu0 %v877_v39  ;;  %v324_v59 = vld [vmem:[#allocation2 + $0x168] sm:$0xff]  ;;  %v322_v60 = vld [vmem:[#allocation2 + $0x158] sm:$0xff]  ;;  %v883_v62 = vpack.c.bf16 %v315_v54, %v311_v53  ;;  %v947_v63 = vpack.c.bf16 %v317_v57, %v313_v55  ;;  %v319_v1 = vld [vmem:[#allocation2 + $0x140] sm:$0xff] }
  0x54   : > { %942 = vmatprep.subr.bf16.mxu1 %v941_v43  ;;  %v326_v61 = vld [vmem:[#allocation2 + $0x178] sm:$0xff]  ;;  %v885_v0 = vpack.c.bf16 %v324_v59, %v320_v58  ;;  %v323_v2 = vld [vmem:[#allocation2 + $0x160] sm:$0xff]  ;;  %v321_v3 = vld [vmem:[#allocation2 + $0x150] sm:$0xff] }
  0x55   : > { %v949_v4 = vpack.c.bf16 %v326_v61, %v322_v60  ;;  %v325_v5 = vld [vmem:[#allocation2 + $0x170] sm:$0xff]  ;;  %v328_v6 = vld [vmem:[#allocation2 + $0x188] sm:$0xff]  ;;  %v330_v8 = vld [vmem:[#allocation2 + $0x198] sm:$0xff]  ;;  %v887_v10 = vpack.c.bf16 %v323_v2, %v319_v1 }
  0x56   : > { %880 = vmatpush1.bf16.msra.mxu0 %v879_v50  ;;  %v332_v7 = vld [vmem:[#allocation2 + $0x1a8] sm:$0xff]  ;;  %v334_v9 = vld [vmem:[#allocation2 + $0x1b8] sm:$0xff]  ;;  %v951_v11 = vpack.c.bf16 %v325_v5, %v321_v3  ;;  %v327_v13 = vld [vmem:[#allocation2 + $0x180] sm:$0xff] }
  0x57   : > { %944 = vmatpush1.bf16.msra.mxu1 %v943_v51  ;;  %882 = vmatprep.subr.bf16.mxu0 %v881_v52  ;;  %v889_v12 = vpack.c.bf16 %v332_v7, %v328_v6  ;;  %v331_v14 = vld [vmem:[#allocation2 + $0x1a0] sm:$0xff]  ;;  %v329_v15 = vld [vmem:[#allocation2 + $0x190] sm:$0xff]  ;;  %v953_v16 = vpack.c.bf16 %v334_v9, %v330_v8  ;;  %v336_v18 = vld [vmem:[#allocation2 + $0x1c8] sm:$0xff] }
  0x58   : > { %946 = vmatprep.subr.bf16.mxu1 %v945_v56  ;;  %v333_v17 = vld [vmem:[#allocation2 + $0x1b0] sm:$0xff]  ;;  %v340_v19 = vld [vmem:[#allocation2 + $0x1e8] sm:$0xff]  ;;  %v338_v20 = vld [vmem:[#allocation2 + $0x1d8] sm:$0xff]  ;;  %v891_v22 = vpack.c.bf16 %v331_v14, %v327_v13 }
  0x59   : > { %v342_v21 = vld [vmem:[#allocation2 + $0x1f8] sm:$0xff]  ;;  %v955_v23 = vpack.c.bf16 %v333_v17, %v329_v15  ;;  %v893_v24 = vpack.c.bf16 %v340_v19, %v336_v18  ;;  %v335_v25 = vld [vmem:[#allocation2 + $0x1c0] sm:$0xff]  ;;  %v337_v27 = vld [vmem:[#allocation2 + $0x1d0] sm:$0xff] }
  0x5a   : > { %884 = vmatpush1.bf16.msra.mxu0 %v883_v62  ;;  %v339_v26 = vld [vmem:[#allocation2 + $0x1e0] sm:$0xff]  ;;  %v957_v28 = vpack.c.bf16 %v342_v21, %v338_v20  ;;  %v341_v29 = vld [vmem:[#allocation2 + $0x1f0] sm:$0xff]  ;;  %v344_v30 = vld [vmem:[#allocation2 + $0x208] sm:$0xff] }
  0x5b   : > { %948 = vmatpush1.bf16.msra.mxu1 %v947_v63  ;;  %886 = vmatprep.subr.bf16.mxu0 %v885_v0  ;;  %v348_v31 = vld [vmem:[#allocation2 + $0x228] sm:$0xff]  ;;  %v346_v32 = vld [vmem:[#allocation2 + $0x218] sm:$0xff]  ;;  %v895_v34 = vpack.c.bf16 %v339_v26, %v335_v25  ;;  %v959_v35 = vpack.c.bf16 %v341_v29, %v337_v27  ;;  %v343_v37 = vld [vmem:[#allocation2 + $0x200] sm:$0xff] }
  0x5c   : > { %950 = vmatprep.subr.bf16.mxu1 %v949_v4  ;;  %v350_v33 = vld [vmem:[#allocation2 + $0x238] sm:$0xff]  ;;  %v897_v36 = vpack.c.bf16 %v348_v31, %v344_v30  ;;  %v347_v38 = vld [vmem:[#allocation2 + $0x220] sm:$0xff]  ;;  %v345_v39 = vld [vmem:[#allocation2 + $0x210] sm:$0xff] }
  0x5d   : > { %v961_v40 = vpack.c.bf16 %v350_v33, %v346_v32  ;;  %v349_v41 = vld [vmem:[#allocation2 + $0x230] sm:$0xff]  ;;  %v352_v42 = vld [vmem:[#allocation2 + $0x248] sm:$0xff]  ;;  %v354_v44 = vld [vmem:[#allocation2 + $0x258] sm:$0xff]  ;;  %v899_v46 = vpack.c.bf16 %v347_v38, %v343_v37 }
  0x5e   : > { %888 = vmatpush1.bf16.msra.mxu0 %v887_v10  ;;  %v356_v43 = vld [vmem:[#allocation2 + $0x268] sm:$0xff]  ;;  %v358_v45 = vld [vmem:[#allocation2 + $0x278] sm:$0xff]  ;;  %v963_v47 = vpack.c.bf16 %v349_v41, %v345_v39  ;;  %v351_v49 = vld [vmem:[#allocation2 + $0x240] sm:$0xff] }
  0x5f   : > { %952 = vmatpush1.bf16.msra.mxu1 %v951_v11  ;;  %890 = vmatprep.subr.bf16.mxu0 %v889_v12  ;;  %v901_v48 = vpack.c.bf16 %v356_v43, %v352_v42  ;;  %v355_v50 = vld [vmem:[#allocation2 + $0x260] sm:$0xff]  ;;  %v353_v51 = vld [vmem:[#allocation2 + $0x250] sm:$0xff]  ;;  %v965_v52 = vpack.c.bf16 %v358_v45, %v354_v44  ;;  %v360_v54 = vld [vmem:[#allocation2 + $0x288] sm:$0xff] }
  0x60   : > { %954 = vmatprep.subr.bf16.mxu1 %v953_v16  ;;  %v357_v53 = vld [vmem:[#allocation2 + $0x270] sm:$0xff]  ;;  %v364_v55 = vld [vmem:[#allocation2 + $0x2a8] sm:$0xff]  ;;  %v362_v56 = vld [vmem:[#allocation2 + $0x298] sm:$0xff]  ;;  %v903_v58 = vpack.c.bf16 %v355_v50, %v351_v49 }
  0x61   : > { %v366_v57 = vld [vmem:[#allocation2 + $0x2b8] sm:$0xff]  ;;  %v967_v59 = vpack.c.bf16 %v357_v53, %v353_v51  ;;  %v905_v60 = vpack.c.bf16 %v364_v55, %v360_v54  ;;  %v359_v61 = vld [vmem:[#allocation2 + $0x280] sm:$0xff]  ;;  %v361_v63 = vld [vmem:[#allocation2 + $0x290] sm:$0xff] }
  0x62   : > { %892 = vmatpush1.bf16.msra.mxu0 %v891_v22  ;;  %v363_v62 = vld [vmem:[#allocation2 + $0x2a0] sm:$0xff]  ;;  %v969_v0 = vpack.c.bf16 %v366_v57, %v362_v56  ;;  %v365_v1 = vld [vmem:[#allocation2 + $0x2b0] sm:$0xff]  ;;  %v368_v2 = vld [vmem:[#allocation2 + $0x2c8] sm:$0xff] }
  0x63   : > { %956 = vmatpush1.bf16.msra.mxu1 %v955_v23  ;;  %894 = vmatprep.subr.bf16.mxu0 %v893_v24  ;;  %v372_v3 = vld [vmem:[#allocation2 + $0x2e8] sm:$0xff]  ;;  %v370_v4 = vld [vmem:[#allocation2 + $0x2d8] sm:$0xff]  ;;  %v907_v6 = vpack.c.bf16 %v363_v62, %v359_v61  ;;  %v367_v7 = vld [vmem:[#allocation2 + $0x2c0] sm:$0xff]  ;;  %v971_v8 = vpack.c.bf16 %v365_v1, %v361_v63 }
  0x64   : > { %958 = vmatprep.subr.bf16.mxu1 %v957_v28  ;;  %v374_v5 = vld [vmem:[#allocation2 + $0x2f8] sm:$0xff]  ;;  %v909_v9 = vpack.c.bf16 %v372_v3, %v368_v2  ;;  %v371_v10 = vld [vmem:[#allocation2 + $0x2e0] sm:$0xff]  ;;  %v369_v11 = vld [vmem:[#allocation2 + $0x2d0] sm:$0xff] }
  0x65   : > { %v373_v12 = vld [vmem:[#allocation2 + $0x2f0] sm:$0xff]  ;;  %v973_v13 = vpack.c.bf16 %v374_v5, %v370_v4  ;;  %v376_v14 = vld [vmem:[#allocation2 + $0x308] sm:$0xff]  ;;  %v378_v17 = vld [vmem:[#allocation2 + $0x318] sm:$0xff]  ;;  %v911_v19 = vpack.c.bf16 %v371_v10, %v367_v7 }
  0x66   : > { %896 = vmatpush1.bf16.msra.mxu0 %v895_v34  ;;  %v380_v15 = vld [vmem:[#allocation2 + $0x328] sm:$0xff]  ;;  %v382_v18 = vld [vmem:[#allocation2 + $0x338] sm:$0xff]  ;;  %v975_v20 = vpack.c.bf16 %v373_v12, %v369_v11  ;;  %v375_v22 = vld [vmem:[#allocation2 + $0x300] sm:$0xff] }
  0x67   : > { %960 = vmatpush1.bf16.msra.mxu1 %v959_v35  ;;  %898 = vmatprep.subr.bf16.mxu0 %v897_v36  ;;  %v278_v16 = vld [vmem:[%s1301_s26 + $0x8] sm:$0xff]  ;;  %v913_v21 = vpack.c.bf16 %v380_v15, %v376_v14  ;;  %v379_v23 = vld [vmem:[#allocation2 + $0x320] sm:$0xff]  ;;  %v377_v24 = vld [vmem:[#allocation2 + $0x310] sm:$0xff]  ;;  %v977_v25 = vpack.c.bf16 %v382_v18, %v378_v17 }
  0x68   : > { %962 = vmatprep.subr.bf16.mxu1 %v961_v40  ;;  %471 = vmatprep.mubr.f32.mxu0 %v278_v16  ;;  %v381_v26 = vld [vmem:[#allocation2 + $0x330] sm:$0xff]  ;;  %v384_v27 = vld [vmem:[#allocation2 + $0x348] sm:$0xff]  ;;  %v386_v29 = vld [vmem:[#allocation2 + $0x358] sm:$0xff]  ;;  %v915_v31 = vpack.c.bf16 %v379_v23, %v375_v22 }
  0x69   : > { %542 = vmatprep.mubr.f32.mxu1 %v278_v16  ;;  %v388_v28 = vld [vmem:[#allocation2 + $0x368] sm:$0xff]  ;;  %v390_v30 = vld [vmem:[#allocation2 + $0x378] sm:$0xff]  ;;  %v979_v32 = vpack.c.bf16 %v381_v26, %v377_v24  ;;  %v383_v34 = vld [vmem:[#allocation2 + $0x340] sm:$0xff] }
  0x6a   : > { %900 = vmatpush1.bf16.msra.mxu0 %v899_v46  ;;  %v917_v33 = vpack.c.bf16 %v388_v28, %v384_v27  ;;  %v387_v35 = vld [vmem:[#allocation2 + $0x360] sm:$0xff]  ;;  %v385_v36 = vld [vmem:[#allocation2 + $0x350] sm:$0xff]  ;;  %v981_v37 = vpack.c.bf16 %v390_v30, %v386_v29  ;;  %v392_v39 = vld [vmem:[#allocation2 + $0x388] sm:$0xff] }
  0x6b   : > { %964 = vmatpush1.bf16.msra.mxu1 %v963_v47  ;;  %902 = vmatprep.subr.bf16.mxu0 %v901_v48  ;;  %v389_v38 = vld [vmem:[#allocation2 + $0x370] sm:$0xff]  ;;  %v396_v40 = vld [vmem:[#allocation2 + $0x3a8] sm:$0xff]  ;;  %v394_v41 = vld [vmem:[#allocation2 + $0x398] sm:$0xff]  ;;  %v919_v43 = vpack.c.bf16 %v387_v35, %v383_v34 }
  0x6c   : > { %966 = vmatprep.subr.bf16.mxu1 %v965_v52  ;;  %v398_v42 = vld [vmem:[#allocation2 + $0x3b8] sm:$0xff]  ;;  %v983_v44 = vpack.c.bf16 %v389_v38, %v385_v36  ;;  %v921_v45 = vpack.c.bf16 %v396_v40, %v392_v39  ;;  %v391_v46 = vld [vmem:[#allocation2 + $0x380] sm:$0xff]  ;;  %v393_v48 = vld [vmem:[#allocation2 + $0x390] sm:$0xff] }
  0x6d   : > { %v395_v47 = vld [vmem:[#allocation2 + $0x3a0] sm:$0xff]  ;;  %v985_v49 = vpack.c.bf16 %v398_v42, %v394_v41  ;;  %v397_v50 = vld [vmem:[#allocation2 + $0x3b0] sm:$0xff]  ;;  %v400_v51 = vld [vmem:[#allocation2 + $0x3c8] sm:$0xff] }
  0x6e   : > { %904 = vmatpush1.bf16.msra.mxu0 %v903_v58  ;;  %v404_v52 = vld [vmem:[#allocation2 + $0x3e8] sm:$0xff]  ;;  %v402_v53 = vld [vmem:[#allocation2 + $0x3d8] sm:$0xff]  ;;  %v923_v55 = vpack.c.bf16 %v395_v47, %v391_v46  ;;  %v987_v56 = vpack.c.bf16 %v397_v50, %v393_v48  ;;  %v399_v58 = vld [vmem:[#allocation2 + $0x3c0] sm:$0xff] }
  0x6f   : > { %968 = vmatpush1.bf16.msra.mxu1 %v967_v59  ;;  %906 = vmatprep.subr.bf16.mxu0 %v905_v60  ;;  %v406_v54 = vld [vmem:[#allocation2 + $0x3f8] sm:$0xff]  ;;  %v925_v57 = vpack.c.bf16 %v404_v52, %v400_v51  ;;  %v403_v59 = vld [vmem:[#allocation2 + $0x3e0] sm:$0xff]  ;;  %v401_v60 = vld [vmem:[#allocation2 + $0x3d0] sm:$0xff] }
  0x70   : > { %970 = vmatprep.subr.bf16.mxu1 %v969_v0  ;;  %v989_v61 = vpack.c.bf16 %v406_v54, %v402_v53  ;;  %v405_v62 = vld [vmem:[#allocation2 + $0x3f0] sm:$0xff]  ;;  %v571_v63 = vld [vmem:[#allocation4 + $0x80] sm:$0xff]  ;;  %v572_v0 = vld [vmem:[#allocation4 + $0x88] sm:$0xff]  ;;  %v927_v1 = vpack.c.bf16 %v403_v59, %v399_v58 }
  0x71   : > { %v991_v2 = vpack.c.bf16 %v405_v62, %v401_v60  ;;  %v993_v3 = vpack.c.bf16 %v572_v0, %v571_v63  ;;  %v555_v4 = vld [vmem:[#allocation4] sm:$0xff]  ;;  %v556_v5 = vld [vmem:[#allocation4 + $0x8] sm:$0xff]  ;;  %v574_v7 = vld [vmem:[#allocation4 + $0x98] sm:$0xff] }
  0x72   : > { %908 = vmatpush1.bf16.msra.mxu0 %v907_v6  ;;  %v573_v6 = vld [vmem:[#allocation4 + $0x90] sm:$0xff]  ;;  %v558_v12 = vld [vmem:[#allocation4 + $0x18] sm:$0xff]  ;;  %v576_v14 = vld [vmem:[#allocation4 + $0xa8] sm:$0xff] }
  0x73   : > { %972 = vmatpush1.bf16.msra.mxu1 %v971_v8  ;;  %910 = vmatprep.subr.bf16.mxu0 %v909_v9  ;;  %v277_v8 = vld [vmem:[%s1301_s26] sm:$0xff]  ;;  %v995_v9 = vpack.c.bf16 %v556_v5, %v555_v4  ;;  %v997_v10 = vpack.c.bf16 %v574_v7, %v573_v6  ;;  %v557_v11 = vld [vmem:[#allocation4 + $0x10] sm:$0xff]  ;;  %v560_v18 = vld [vmem:[#allocation4 + $0x28] sm:$0xff] }
  0x74   : > { %974 = vmatprep.subr.bf16.mxu1 %v973_v13  ;;  %v575_v13 = vld [vmem:[#allocation4 + $0xa0] sm:$0xff]  ;;  %v999_v15 = vpack.c.bf16 %v558_v12, %v557_v11  ;;  %v561_v23 = vld [vmem:[#allocation4 + $0x30] sm:$0xff]  ;;  %v562_v24 = vld [vmem:[#allocation4 + $0x38] sm:$0xff] }
  0x75   : > { %v1001_v16 = vpack.c.bf16 %v576_v14, %v575_v13  ;;  %v559_v17 = vld [vmem:[#allocation4 + $0x20] sm:$0xff]  ;;  %v580_v26 = vld [vmem:[#allocation4 + $0xc8] sm:$0xff]  ;;  %v1007_v27 = vpack.c.bf16 %v562_v24, %v561_v23  ;;  %v565_v35 = vld [vmem:[#allocation4 + $0x50] sm:$0xff] }
  0x76   : > { %912 = vmatpush1.bf16.msra.mxu0 %v911_v19  ;;  %v577_v19 = vld [vmem:[#allocation4 + $0xb0] sm:$0xff]  ;;  %v563_v29 = vld [vmem:[#allocation4 + $0x40] sm:$0xff]  ;;  %v564_v30 = vld [vmem:[#allocation4 + $0x48] sm:$0xff] }
  0x77   : > { %976 = vmatpush1.bf16.msra.mxu1 %v975_v20  ;;  %914 = vmatprep.subr.bf16.mxu0 %v913_v21  ;;  %v578_v20 = vld [vmem:[#allocation4 + $0xb8] sm:$0xff]  ;;  %v1003_v21 = vpack.c.bf16 %v560_v18, %v559_v17  ;;  %v584_v38 = vld [vmem:[#allocation4 + $0xe8] sm:$0xff]  ;;  %v567_v41 = vld [vmem:[#allocation4 + $0x60] sm:$0xff] }
  0x78   : > { %978 = vmatprep.subr.bf16.mxu1 %v977_v25  ;;  %v1005_v22 = vpack.c.bf16 %v578_v20, %v577_v19  ;;  %v579_v25 = vld [vmem:[#allocation4 + $0xc0] sm:$0xff]  ;;  %v566_v36 = vld [vmem:[#allocation4 + $0x58] sm:$0xff]  ;;  %v568_v42 = vld [vmem:[#allocation4 + $0x68] sm:$0xff] }
  0x79   : > { %v1009_v28 = vpack.c.bf16 %v580_v26, %v579_v25  ;;  %v1015_v39 = vpack.c.bf16 %v566_v36, %v565_v35  ;;  %v569_v47 = vld [vmem:[#allocation4 + $0x70] sm:$0xff]  ;;  %v570_v48 = vld [vmem:[#allocation4 + $0x78] sm:$0xff] }
  0x7a   : > { %916 = vmatpush1.bf16.msra.mxu0 %v915_v31  ;;  %v581_v31 = vld [vmem:[#allocation4 + $0xd0] sm:$0xff] }
  0x7b   : > { %980 = vmatpush1.bf16.msra.mxu1 %v979_v32  ;;  %918 = vmatprep.subr.bf16.mxu0 %v917_v33  ;;  %v582_v32 = vld [vmem:[#allocation4 + $0xd8] sm:$0xff]  ;;  %v1011_v33 = vpack.c.bf16 %v564_v30, %v563_v29 }
  0x7c   : > { %982 = vmatprep.subr.bf16.mxu1 %v981_v37  ;;  %v1013_v34 = vpack.c.bf16 %v582_v32, %v581_v31  ;;  %v583_v37 = vld [vmem:[#allocation4 + $0xe0] sm:$0xff] }
  0x7d   : > { %v1017_v40 = vpack.c.bf16 %v584_v38, %v583_v37 }
  0x7e   : > { %920 = vmatpush1.bf16.msra.mxu0 %v919_v43  ;;  %v1019_v43 = vpack.c.bf16 %v568_v42, %v567_v41 }
  0x7f   : > { %984 = vmatpush1.bf16.msra.mxu1 %v983_v44  ;;  %922 = vmatprep.subr.bf16.mxu0 %v921_v45  ;;  %v585_v44 = vld [vmem:[#allocation4 + $0xf0] sm:$0xff]  ;;  %v586_v45 = vld [vmem:[#allocation4 + $0xf8] sm:$0xff] }
  0x80   : > { %986 = vmatprep.subr.bf16.mxu1 %v985_v49  ;;  %v1021_v46 = vpack.c.bf16 %v586_v45, %v585_v44  ;;  %v1023_v49 = vpack.c.bf16 %v570_v48, %v569_v47 }
  0x82   : > { %924 = vmatpush1.bf16.msra.mxu0 %v923_v55 }
  0x83   : > { %988 = vmatpush1.bf16.msra.mxu1 %v987_v56  ;;  %926 = vmatprep.subr.bf16.mxu0 %v925_v57 }
  0x84   : > { %990 = vmatprep.subr.bf16.mxu1 %v989_v61 }
  0x86   : > { %928 = vmatpush1.bf16.msra.mxu0 %v927_v1 }
  0x87   : > { %992 = vmatpush1.bf16.msra.mxu1 %v991_v2  ;;  %994 = vmatprep.subr.bf16.mxu0 %v993_v3 }
  0x89   : > { %472 = vmatmul.mubr.f32.vlgmr.msra.gmra.mrb[0].mxu0 %v277_v8 }
  0x8a   : > { %543 = vmatmul.mubr.f32.vlgmr.msra.gmra.mrb[0].mxu1 %v277_v8  ;;  %996 = vmatpush3.bf16.msra.mxu0 %v995_v9 }
  0x8b   : > { %998 = vmatprep.subr.bf16.mxu0 %v997_v10 }
  0x8e   : > { %1000 = vmatpush3.bf16.msra.mxu0 %v999_v15 }
  0x8f   : > { %1002 = vmatprep.subr.bf16.mxu0 %v1001_v16 }
  0x92   : > { %1004 = vmatpush3.bf16.msra.mxu0 %v1003_v21 }
  0x93   : > { %1006 = vmatprep.subr.bf16.mxu0 %v1005_v22 }
  0x96   : > { %1008 = vmatpush3.bf16.msra.mxu0 %v1007_v27 }
  0x97   : > { %1010 = vmatprep.subr.bf16.mxu0 %v1009_v28 }
  0x9a   : > { %1012 = vmatpush3.bf16.msra.mxu0 %v1011_v33 }
  0x9b   : > { %1014 = vmatprep.subr.bf16.mxu0 %v1013_v34 }
  0x9e   : > { %1016 = vmatpush3.bf16.msra.mxu0 %v1015_v39 }
  0x9f   : > { %1018 = vmatprep.subr.bf16.mxu0 %v1017_v40 }
  0xa2   : > { %1020 = vmatpush3.bf16.msra.mxu0 %v1019_v43 }
  0xa3   : > { %1022 = vmatprep.subr.bf16.mxu0 %v1021_v46 }
  0xa6   : > { %1024 = vmatpush3.bf16.msra.mxu0 %v1023_v49 }
 0x15c   : > { %v473_v50 = vpop.f32.mrb[0].mxu0 }
 0x15d   : > { %v549_v51 = vmul.f32 %v473_v50, %v473_v50  ;;  %v544_v52 = vpop.f32.mrb[0].mxu1  ;;  %v475_v53 = vpop.f32.mrb[1].mxu0 }
 0x15e   : > { %v551_v54 = vmul.f32 %v544_v52, %v544_v52  ;;  %v550_v55 = vmul.f32 %v475_v53, %v475_v53  ;;  %v546_v56 = vpop.f32.mrb[1].mxu1 }
 0x15f   : > { %v552_v57 = vmul.f32 %v546_v56, %v546_v56 }
 0x160   : > { %v553_v58 = vadd.f32 %v551_v54, %v549_v51 }
 0x161   : > { %v554_v59 = vadd.f32 %v552_v57, %v550_v55 }
 0x163   : > { %651 = vmatprep.mubr.f32.mxu0 %v554_v59 }
 0x164   : > { %652 = vmatmul.mubr.f32.vlgmr.msra.gmra.mrb[2].mxu0 %v553_v58 }
 0x237   : > { %v862_v60 = vpop.f32.mrb[2].mxu0 }
 0x238   : > { %v863_v61 = vpop.f32.mrb[3].mxu0 }
 0x239   : > { %v864_v62 = vadd.f32 %v863_v61, %v862_v60 }
 0x23b   : > { %v657_v63 = vmax.f32 %v864_v62, 1e-10 }
 0x23d   : > { %1074 = vlog2.f32 %v657_v63 }
 0x247   : > { %v1075_v0 = vpop.eup %1074 }
 0x248   : > { %v659_v1 = vmul.f32 0.6931472, %v1075_v0 }
 0x24a   : > { %v660_v2 = vmul.f32 0.4342945, %v659_v1 }
 0x24c   : > { %v661_v3 = vmul.f32 10.0, %v660_v2 }
 0x24e   : > { %662 = vst [vmem:[%s270_s10] sm:$0xff] %v661_v3  ;;  %v670_v4 = vrot.slane %v661_v3, 4 }
 0x250   : > { %v671_v5 = vmax.f32 %v661_v3, %v670_v4 }
 0x252   : > { %v672_v6 = vrot.slane %v671_v5, 2 }
 0x254   : > { %v673_v7 = vmax.f32 %v671_v5, %v672_v6 }
 0x256   : > { %v674_v8 = vrot.slane %v673_v7, 1 }
 0x258   : > { %v675_v9 = vmax.f32 %v673_v7, %v674_v8 }
 0x25a   : > { %676 = vst [vmem:[%s276_s13] sm:$0x1] %v675_v9 }
 0x25b PF: > { %s17_s17 = sadd.s32 1, %s1162_s17   ;;  %s1335_s15 = smov %s1158_s16 }
 0x25c   : > { %p14_p3 = scmp.ge.s32.totalorder %s17_s17, 4   ;;  %s1336_s16 = smov %s1338_s19 }
 0x25e   :  { %16 = sbr.rel (!%p14_p3) target bundleno = 3 (0x3), region = 83 }
 0x265   :  { %720 = vsyncpa [#allocation3], 1 }
 0x266   :  { %722 = vsyncpa [#allocation3 + $0x1], 1 }
 0x267   :  { %723 = vsyncpa [#allocation5], 1 }

</bundles_post_ra>
